<compile_context>
chip_gen: v7x
topology: tpu7x:2x2x1
jax: 0.10.0
libtpu: 0.0.40
codegen_flags: <defaults>
</compile_context>

<pallas_src>
import math

import jax
import jax.numpy as jnp
from jax.experimental import pallas as pl
from jax.experimental.pallas import tpu as pltpu

D = 128  # padded lane width for every hidden / output feature dimension


# -----------------------------------------------------------------------------
# Pallas kernel: 3-layer MLP  (Linear -> ReLU -> Linear -> ReLU -> Linear)
# -----------------------------------------------------------------------------
def _critic_kernel(x_ref, w_ref, b_ref, o_ref, xw_ref):
    # x_ref : (BM, S)       f32   only the real state features stream from HBM
    # w_ref : (3, 128, 128) bf16  packed zero-padded weights (VMEM-resident)
    # b_ref : (8, 128)      f32   packed zero-padded biases  (VMEM-resident)
    # o_ref : (BM, 128)     bf16  lane-dense output slab
    # xw_ref: (BM, 128)     f32   scratch: lane-widened x
    s = x_ref.shape[1]

    # Widen x from S real lanes to the 128-lane matmul operand *inside* the
    # kernel.  Zeroed every step so the kernel is stateless (safe under
    # megacore "parallel" partitioning of the batch axis).
    xw_ref[...] = jnp.zeros_like(xw_ref)
    xw_ref[:, 0:s] = x_ref[...]
    x = xw_ref[...].astype(jnp.bfloat16)

    h1 = jnp.dot(x, w_ref[0], preferred_element_type=jnp.float32) + b_ref[0:1, :]
    h1 = jnp.maximum(h1, 0.0)                                  # relu(layer1(x))

    h2 = jnp.dot(h1.astype(jnp.bfloat16), w_ref[1],
                 preferred_element_type=jnp.float32) + b_ref[1:2, :]
    h2 = jnp.maximum(h2, 0.0)                                  # relu(layer2(y))

    y = jnp.dot(h2.astype(jnp.bfloat16), w_ref[2],
                preferred_element_type=jnp.float32) + b_ref[2:3, :]
    o_ref[...] = y.astype(o_ref.dtype)                         # bf16 store (2x smaller HBM write)


# -----------------------------------------------------------------------------
# One-time packing of parameters (done at init; kept device-resident).
# -----------------------------------------------------------------------------
def pack_params(params):
    def padw(w):
        fi, fo = w.shape
        return jnp.pad(w, ((0, D - fi), (0, D - fo))).astype(jnp.bfloat16)

    w_packed = jnp.stack(
        [padw(params["w1"]), padw(params["w2"]), padw(params["w3"])], axis=0)

    b_packed = jnp.zeros((8, D), jnp.float32)
    b_packed = b_packed.at[0, : params["b1"].shape[0]].set(params["b1"])
    b_packed = b_packed.at[1, : params["b2"].shape[0]].set(params["b2"])
    b_packed = b_packed.at[2, : params["b3"].shape[0]].set(params["b3"])

    return {
        "w": w_packed,                       # (3, 128, 128) bf16
        "b": b_packed,                       # (8, 128)      f32
        "state_dim": params["w1"].shape[0],  # static ints
        "action_dim": params["w3"].shape[1],
    }


def pack_params_pair(packed_online, packed_target):
    """Stack two packed parameter sets (online + target net) once at init."""
    assert packed_online["state_dim"] == packed_target["state_dim"]
    assert packed_online["action_dim"] == packed_target["action_dim"]
    return {
        "w": jnp.stack([packed_online["w"], packed_target["w"]], axis=0),  # (2,3,128,128)
        "b": jnp.stack([packed_online["b"], packed_target["b"]], axis=0),  # (2,8,128)
        "state_dim": packed_online["state_dim"],
        "action_dim": packed_online["action_dim"],
    }


# -----------------------------------------------------------------------------
# Batch-tile choice
# -----------------------------------------------------------------------------
def _choose_bm(batch, bm_max=2048):
    """Per-step batch tile: as large as possible (per-step overhead dominates
    the tiny compute), rounded to a multiple of 16 (clean bf16 sublane
    packing).  For batch > 256 force >= 2 grid steps so the 'parallel' batch
    axis shards across both TensorCores on v7x."""
    r16 = lambda n: ((n + 15) // 16) * 16
    if batch <= 256:
        return min(r16(max(batch, 1)), bm_max)
    return min(r16((batch + 1) // 2), bm_max)


# -----------------------------------------------------------------------------
# Forward wrapper (single network)
# -----------------------------------------------------------------------------
def critic_forward(x, packed, *, bm_max=2048):
    B, state_dim = x.shape
    assert state_dim == packed["state_dim"]
    action_dim = packed["action_dim"]

    BM = _choose_bm(B, bm_max)
    n_bt = pl.cdiv(B, BM)
    BP = n_bt * BM

    xp = x.astype(jnp.float32)
    if BP != B:
        xp = jnp.pad(xp, ((0, BP - B), (0, 0)))      # pad batch rows only (tiny, zeros inert)

    out = pl.pallas_call(
        _critic_kernel,
        out_shape=jax.ShapeDtypeStruct((BP, D), jnp.bfloat16),
        grid=(n_bt,),
        in_specs=[
            # x streamed per batch tile with only `state_dim` real lanes
            # (last block dim == full array dim, so (BM, 4) is legal).
            pl.BlockSpec((BM, state_dim), lambda i: (i, 0)),
            # Constant index_map -> fetched once, VMEM-resident across steps.
            pl.BlockSpec((3, D, D), lambda i: (0, 0, 0)),
            pl.BlockSpec((8, D), lambda i: (0, 0)),
        ],
        out_specs=pl.BlockSpec((BM, D), lambda i: (i, 0)),
        scratch_shapes=[pltpu.VMEM((BM, D), jnp.float32)],
        compiler_params=pltpu.CompilerParams(
            dimension_semantics=("parallel",)),       # v7x: both TensorCores
    )(xp, packed["w"], packed["b"])

    return out[:B, :action_dim].astype(jnp.float32)


# -----------------------------------------------------------------------------
# Fused forward for BOTH networks (online + target) in one launch — standard
# DDQN evaluates two critics on the same batch; this halves dispatch overhead.
# -----------------------------------------------------------------------------
def critic_forward_pair(x, packed_pair, *, bm_max=2048):
    B, state_dim = x.shape
    assert state_dim == packed_pair["state_dim"]
    action_dim = packed_pair["action_dim"]

    BM = _choose_bm(B, bm_max)
    n_bt = pl.cdiv(B, BM)
    BP = n_bt * BM

    xp = x.astype(jnp.float32)
    if BP != B:
        xp = jnp.pad(xp, ((0, BP - B), (0, 0)))

    out = pl.pallas_call(
        _critic_kernel,
        out_shape=jax.ShapeDtypeStruct((2, BP, D), jnp.bfloat16),
        grid=(2, n_bt),                               # (weight set, batch tile)
        in_specs=[
            pl.BlockSpec((BM, state_dim), lambda s, i: (i, 0)),
            pl.BlockSpec((None, 3, D, D), lambda s, i: (s, 0, 0, 0)),
            pl.BlockSpec((None, 8, D), lambda s, i: (s, 0, 0)),
        ],
        out_specs=pl.BlockSpec((None, BM, D), lambda s, i: (s, i, 0)),
        scratch_shapes=[pltpu.VMEM((BM, D), jnp.float32)],
        compiler_params=pltpu.CompilerParams(
            dimension_semantics=("parallel", "parallel")),
    )(xp, packed_pair["w"], packed_pair["b"])

    q_online = out[0, :B, :action_dim].astype(jnp.float32)
    q_target = out[1, :B, :action_dim].astype(jnp.float32)
    return q_online, q_target


# -----------------------------------------------------------------------------
# Deterministic parameter init (mirrors the PyTorch module's init scheme:
# weights ~ U(-sqrt(6/fan_in), sqrt(6/fan_in)); biases keep nn.Linear's default
# U(-1/sqrt(fan_in), 1/sqrt(fan_in))).
# -----------------------------------------------------------------------------
def init_params(key, state_dim, action_dim):
    def linear(key, fan_in, fan_out):
        kw, kb = jax.random.split(key)
        wb = math.sqrt(6.0 / fan_in)
        bb = 1.0 / math.sqrt(fan_in)
        w = jax.random.uniform(kw, (fan_in, fan_out), jnp.float32, -wb, wb)
        b = jax.random.uniform(kb, (fan_out,), jnp.float32, -bb, bb)
        return w, b

    k1, k2, k3 = jax.random.split(key, 3)
    w1, b1 = linear(k1, state_dim, 24)
    w2, b2 = linear(k2, 24, 24)
    w3, b3 = linear(k3, 24, action_dim)
    return {"w1": w1, "b1": b1, "w2": w2, "b2": b2, "w3": w3, "b3": b3}


# -----------------------------------------------------------------------------
# References: one mirroring the kernel's numerics exactly (tight check), one in
# true f32 (loose semantic-fidelity check vs. the PyTorch module).
# -----------------------------------------------------------------------------
def reference_forward_bf16(x, p):
    c = lambda a: a.astype(jnp.bfloat16)
    h1 = jnp.maximum(jnp.dot(c(x), c(p["w1"]),
                             preferred_element_type=jnp.float32) + p["b1"], 0.0)
    h2 = jnp.maximum(jnp.dot(c(h1), c(p["w2"]),
                             preferred_element_type=jnp.float32) + p["b2"], 0.0)
    y = jnp.dot(c(h2), c(p["w3"]), preferred_element_type=jnp.float32) + p["b3"]
    return y.astype(jnp.bfloat16).astype(jnp.float32)


def reference_forward_f32(x, p):
    hi = jax.lax.Precision.HIGHEST
    h1 = jnp.maximum(jnp.dot(x, p["w1"], precision=hi) + p["b1"], 0.0)
    h2 = jnp.maximum(jnp.dot(h1, p["w2"], precision=hi) + p["b2"], 0.0)
    return jnp.dot(h2, p["w3"], precision=hi) + p["b3"]


def _check(name, y, x, p):
    y_b = reference_forward_bf16(x, p)
    assert jnp.allclose(y, y_b, atol=2e-2, rtol=2e-2), \
        f"{name}: mismatch vs bf16-mirrored reference"
    # Loose sanity check vs. true f32 semantics (bf16 operands/output are an
    # intentional deviation; check the mean error, which is robust).
    mae = float(jnp.mean(jnp.abs(y - reference_forward_f32(x, p))))
    assert mae < 0.1, f"{name}: mean |err| vs f32 reference too large: {mae}"


if __name__ == "__main__":
    state_dim, action_dim = 4, 2          # CartPole: 4-dim state, 2 actions

    key = jax.random.PRNGKey(0)
    kx1, kx2, kp_on, kp_tg = jax.random.split(key, 4)

    params_online = init_params(kp_on, state_dim, action_dim)
    params_target = init_params(kp_tg, state_dim, action_dim)

    packed_online = pack_params(params_online)          # one-time packing
    packed_target = pack_params(params_target)
    packed_pair = pack_params_pair(packed_online, packed_target)

    # 1) Tiny batch (single grid step), like acting in the environment.
    x_small = jax.random.normal(kx1, (2, state_dim), jnp.float32)
    q_small = jax.block_until_ready(critic_forward(x_small, packed_online))
    assert q_small.shape == (2, action_dim)
    _check("small-batch", q_small, x_small, params_online)

    # 2) Training-size batch (>256 -> >=2 grid steps; exercises tiling, batch
    #    padding, and v7x dual-TensorCore sharding of the 'parallel' axis).
    x_train = jax.random.normal(kx2, (300, state_dim), jnp.float32)
    q_train = jax.block_until_ready(critic_forward(x_train, packed_online))
    assert q_train.shape == (300, action_dim)
    _check("multi-tile", q_train, x_train, params_online)

    # 3) Fused online + target evaluation in a single pallas_call (DDQN update).
    q_on, q_tg = critic_forward_pair(x_train, packed_pair)
    q_on = jax.block_until_ready(q_on)
    q_tg = jax.block_until_ready(q_tg)
    assert q_on.shape == (300, action_dim) and q_tg.shape == (300, action_dim)
    _check("pair/online", q_on, x_train, params_online)
    _check("pair/target", q_tg, x_train, params_target)

    # TODO(synk): train()/Adam/MSELoss and update_target_weights() are
    # host-side training logic outside forward(); not part of this kernel.
    print("KERNEL_OK")
</pallas_src>

<mosaic_0001>
module attributes {stable_mosaic.version = 11 : i64} {
  func.func @_critic_kernel(%arg0: i32, %arg1: memref<16x4xf32, #tpu.memory_space<vmem>>, %arg2: memref<3x128x128xbf16, #tpu.memory_space<vmem>>, %arg3: memref<8x128xf32, #tpu.memory_space<vmem>>, %arg4: memref<16x128xbf16, #tpu.memory_space<vmem>>, %arg5: memref<16x128xf32, #tpu.memory_space<vmem>>) attributes {dimension_semantics = [#tpu.dimension_semantics<parallel>], iteration_bounds = array<i64: 1>, scalar_prefetch = 0 : i64, scratch_operands = 1 : i64, tpu.core_type = #tpu.core_type<tc>, window_params = [{transform_indices = @transform_0, window_bounds = array<i64: 16, 4>}, {pipeline_mode = #tpu.pipeline_mode<synchronous>, transform_indices = @transform_1, window_bounds = array<i64: 3, 128, 128>}, {pipeline_mode = #tpu.pipeline_mode<synchronous>, transform_indices = @transform_2, window_bounds = array<i64: 8, 128>}, {transform_indices = @transform_3, window_bounds = array<i64: 16, 128>}]} {
    %cst = arith.constant 0.000000e+00 : f32
    %0 = vector.broadcast %cst : f32 to vector<16x128xf32>
    %c0 = arith.constant 0 : index
    %c0_0 = arith.constant 0 : index
    %1 = vector.load %arg5[%c0, %c0_0] : memref<16x128xf32, #tpu.memory_space<vmem>>, vector<16x128xf32>
    tpu.vector_store %arg5[%c0, %c0_0], %0 {strides = array<i32>} : memref<16x128xf32, #tpu.memory_space<vmem>>, vector<16x128xf32>,
    %c0_1 = arith.constant 0 : index
    %c0_2 = arith.constant 0 : index
    %2 = vector.load %arg1[%c0_1, %c0_2] : memref<16x4xf32, #tpu.memory_space<vmem>>, vector<16x4xf32>
    %c0_3 = arith.constant 0 : index
    %c0_4 = arith.constant 0 : index
    %3 = vector.load %arg5[%c0_3, %c0_4] : memref<16x128xf32, #tpu.memory_space<vmem>>, vector<16x4xf32>
    tpu.vector_store %arg5[%c0_3, %c0_4], %2 {strides = array<i32>} : memref<16x128xf32, #tpu.memory_space<vmem>>, vector<16x4xf32>,
    %c0_5 = arith.constant 0 : index
    %c0_6 = arith.constant 0 : index
    %4 = vector.load %arg5[%c0_5, %c0_6] : memref<16x128xf32, #tpu.memory_space<vmem>>, vector<16x128xf32>
    %5 = arith.truncf %4 : vector<16x128xf32> to vector<16x128xbf16>
    %c0_7 = arith.constant 0 : index
    %c0_8 = arith.constant 0 : index
    %c0_9 = arith.constant 0 : index
    %6 = vector.load %arg2[%c0_7, %c0_8, %c0_9] : memref<3x128x128xbf16, #tpu.memory_space<vmem>>, vector<1x128x128xbf16>
    %7 = vector.shape_cast %6 : vector<1x128x128xbf16> to vector<128x128xbf16>
    %cst_10 = arith.constant dense<0.000000e+00> : vector<16x128xf32>
    %8 = tpu.matmul %5, %7, %cst_10 {dimension_numbers = #tpu.dot_dimension_numbers<[1], [0], [0], [1], [0, 0, 1, 1], [], []>} : vector<16x128xbf16>, vector<128x128xbf16>, vector<16x128xf32> -> vector<16x128xf32>
    %c0_11 = arith.constant 0 : index
    %c0_12 = arith.constant 0 : index
    %9 = vector.load %arg3[%c0_11, %c0_12] : memref<8x128xf32, #tpu.memory_space<vmem>>, vector<1x128xf32>
    %10 = vector.broadcast %9 : vector<1x128xf32> to vector<16x128xf32>
    %11 = arith.addf %8, %10 : vector<16x128xf32>
    %cst_13 = arith.constant 0.000000e+00 : f32
    %12 = vector.broadcast %cst_13 : f32 to vector<16x128xf32>
    %13 = arith.maximumf %11, %12 : vector<16x128xf32>
    %14 = arith.truncf %13 : vector<16x128xf32> to vector<16x128xbf16>
    %c1 = arith.constant 1 : index
    %c0_14 = arith.constant 0 : index
    %c0_15 = arith.constant 0 : index
    %15 = vector.load %arg2[%c1, %c0_14, %c0_15] : memref<3x128x128xbf16, #tpu.memory_space<vmem>>, vector<1x128x128xbf16>
    %16 = vector.shape_cast %15 : vector<1x128x128xbf16> to vector<128x128xbf16>
    %cst_16 = arith.constant dense<0.000000e+00> : vector<16x128xf32>
    %17 = tpu.matmul %14, %16, %cst_16 {dimension_numbers = #tpu.dot_dimension_numbers<[1], [0], [0], [1], [0, 0, 1, 1], [], []>} : vector<16x128xbf16>, vector<128x128xbf16>, vector<16x128xf32> -> vector<16x128xf32>
    %c1_17 = arith.constant 1 : index
    %c0_18 = arith.constant 0 : index
    %18 = vector.load %arg3[%c1_17, %c0_18] : memref<8x128xf32, #tpu.memory_space<vmem>>, vector<1x128xf32>
    %19 = vector.broadcast %18 : vector<1x128xf32> to vector<16x128xf32>
    %20 = arith.addf %17, %19 : vector<16x128xf32>
    %cst_19 = arith.constant 0.000000e+00 : f32
    %21 = vector.broadcast %cst_19 : f32 to vector<16x128xf32>
    %22 = arith.maximumf %20, %21 : vector<16x128xf32>
    %23 = arith.truncf %22 : vector<16x128xf32> to vector<16x128xbf16>
    %c2 = arith.constant 2 : index
    %c0_20 = arith.constant 0 : index
    %c0_21 = arith.constant 0 : index
    %24 = vector.load %arg2[%c2, %c0_20, %c0_21] : memref<3x128x128xbf16, #tpu.memory_space<vmem>>, vector<1x128x128xbf16>
    %25 = vector.shape_cast %24 : vector<1x128x128xbf16> to vector<128x128xbf16>
    %cst_22 = arith.constant dense<0.000000e+00> : vector<16x128xf32>
    %26 = tpu.matmul %23, %25, %cst_22 {dimension_numbers = #tpu.dot_dimension_numbers<[1], [0], [0], [1], [0, 0, 1, 1], [], []>} : vector<16x128xbf16>, vector<128x128xbf16>, vector<16x128xf32> -> vector<16x128xf32>
    %c2_23 = arith.constant 2 : index
    %c0_24 = arith.constant 0 : index
    %27 = vector.load %arg3[%c2_23, %c0_24] : memref<8x128xf32, #tpu.memory_space<vmem>>, vector<1x128xf32>
    %28 = vector.broadcast %27 : vector<1x128xf32> to vector<16x128xf32>
    %29 = arith.addf %26, %28 : vector<16x128xf32>
    %30 = arith.truncf %29 : vector<16x128xf32> to vector<16x128xbf16>
    %c0_25 = arith.constant 0 : index
    %c0_26 = arith.constant 0 : index
    %31 = vector.load %arg4[%c0_25, %c0_26] : memref<16x128xbf16, #tpu.memory_space<vmem>>, vector<16x128xbf16>
    tpu.vector_store %arg4[%c0_25, %c0_26], %30 {strides = array<i32>} : memref<16x128xbf16, #tpu.memory_space<vmem>>, vector<16x128xbf16>,
    return
  }
  func.func @transform_0(%arg0: i32) -> (i32, i32) {
    %c0_i32 = arith.constant 0 : i32
    %c0_i32_0 = arith.constant 0 : i32
    return %arg0, %c0_i32 : i32, i32
  }
  func.func @transform_1(%arg0: i32) -> (i32, i32, i32) {
    %c0_i32 = arith.constant 0 : i32
    %c0_i32_0 = arith.constant 0 : i32
    %c0_i32_1 = arith.constant 0 : i32
    %c0_i32_2 = arith.constant 0 : i32
    return %c0_i32, %c0_i32_0, %c0_i32_1 : i32, i32, i32
  }
  func.func @transform_2(%arg0: i32) -> (i32, i32) {
    %c0_i32 = arith.constant 0 : i32
    %c0_i32_0 = arith.constant 0 : i32
    %c0_i32_1 = arith.constant 0 : i32
    return %c0_i32, %c0_i32_0 : i32, i32
  }
  func.func @transform_3(%arg0: i32) -> (i32, i32) {
    %c0_i32 = arith.constant 0 : i32
    %c0_i32_0 = arith.constant 0 : i32
    return %arg0, %c0_i32 : i32, i32
  }
}

</mosaic_0001>

<bundles_post_ra>
// kernel: tpu_custom_call.1
= control target key start
LH: loop header
LB: loop body
LE: loop exit
PB: predicated region body
PF: predicated region fallthrough
CT: control target
= control target key end

     0   :  { %8 = vsyncpa [#allocation4], 0  ;;  %s709_s0 = inlined_call_operand.vmem [shape: f32[16,4], index: 0, kind: input, shape index: {}]   ;;  %s710_s1 = inlined_call_operand.hbm [shape: bf16[3,128,128], index: 1, kind: input, shape index: {}]   ;;  %s711_s2 = inlined_call_operand.vmem [shape: f32[8,128], index: 2, kind: input, shape index: {}]   ;;  %s712_s3 = inlined_call_operand.hbm [shape: bf16[16,128], index: 3, kind: output, shape index: {}]  }
   0x1   :  { %9 = vsyncpa [#allocation5], 0  ;;  %s606_s12 = smov [#allocation3]   ;;  %s558_s16 = scalar_lea.hbm %s710_s1, 3072 }
   0x2   :  { %s17_s13 = sshll.u32 %s606_s12, 4  ;;  %p559_p0 = scmp.ne.s32.totalorder %s710_s1, %s558_s16  ;;  %s18_s13 = int_to_ptr.vmem [resolvable:$true] %s17_s13 }
   0x3   :  { %p562_p1 = scmp.lt.u32.totalorder %s558_s16, %s710_s1 }
   0x5   :  { %p564_p2 = pnand %p562_p1, %p559_p0 }
   0x7   :  { %567 = shalt.err (!%p564_p2)
}
   0x8   :  { %s568_s21 = scalar_lea.vmem %s18_s13, 3072  ;;  %p573_p4 = scmp.lt.s32.totalorder %s18_s13, %s18_s13 }
   0x9   :  { %p569_p3 = scmp.ne.s32.totalorder %s18_s13, %s568_s21  ;;  %p574_p5 = scmp.lt.s32.totalorder %s568_s21, %s568_s21 }
   0xb   :  { %p575_p6 = por %p574_p5, %p573_p4 }
   0xd   :  { %p576_p7 = pnand %p575_p6, %p569_p3 }
   0xf   :  { %579 = shalt.err (!%p576_p7)
}
  0x10   :  { %s607_s22 = smov 64   ;;  %s608_s23 = smov 4  }
  0x11   :  { %23 = dma.hbm_to_vmem [thread:$0]  %s710_s1, 3072, %s18_s13, [#allocation4], %s607_s22, %s607_s22, %s608_s23  }
  0x12   :  { %602 = dma.done.wait [#allocation4], 3072  }
  0x13   :  { %603 = vsyncadd [#allocation4], 4294964224  ;;  %v609_v0 = vmov 0.0   ;;  %vm610_vm0 = vmmov 0   ;;  %v534_v1 = vld [vmem:[#allocation3] sm:$0xff]   ;;  %v535_v2 = vld [vmem:[#allocation3 + $0x8] sm:$0xff]  }
  0x14   :  { %468 = vmatprep.subr.bf16.mxu0 %v609_v0  ;;  %30 = vst [vmem:[#allocation2] sm:$0xff] %v609_v0  ;;  %31 = vst [vmem:[#allocation2 + $0x8] sm:$0xff] %v609_v0  ;;  %484 = vmatprep.mubr.msk.bf16.mxu0 %vm610_vm0, %v609_v0  ;;  %v536_v3 = vld [vmem:[#allocation3 + $0x10] sm:$0xff]   ;;  %vm34_vm1 = vcmask 31744   ;;  %v32_v4 = vld [vmem:[%s709_s0] sm:$0xff]  ;;  %s611_s7 = smov [#allocation6]  }
  0x15   :  { %488 = vmatprep.subr.bf16.mxu1 %v609_v0  ;;  %504 = vmatprep.mubr.msk.bf16.mxu1 %vm610_vm0, %v609_v0  ;;  %v33_v5 = vld [vmem:[%s709_s0 + $0x8] sm:$0xff]  ;;  %35 = vst.msk [vmem:[#allocation2] sm:$0xff] %vm34_vm1, %v32_v4  ;;  %v537_v7 = vld [vmem:[#allocation3 + $0x18] sm:$0xff]   ;;  %v543_v8 = vld [vmem:[#allocation3 + $0x48] sm:$0xff]   ;;  %s393_s8 = sshll.u32 %s611_s7, 4  ;;  %s394_s8 = int_to_ptr.vmem [resolvable:$true] %s393_s8 }
  0x16   :  { %469 = vmatpush3.bf16.msra.mxu0 %v534_v1  ;;  %36 = vst.msk [vmem:[#allocation2 + $0x8] sm:$0xff] %vm34_vm1, %v33_v5  ;;  %v542_v6 = vld [vmem:[#allocation3 + $0x40] sm:$0xff]   ;;  %v544_v10 = vld [vmem:[#allocation3 + $0x50] sm:$0xff]   ;;  %v539_v11 = vld [vmem:[#allocation3 + $0x28] sm:$0xff]   ;;  %s580_s9 = scalar_lea.vmem %s394_s8, 128  ;;  %p585_p9 = scmp.lt.s32.totalorder %s394_s8, %s394_s8 }
  0x17   :  { %470 = vmatprep.subr.bf16.mxu0 %v609_v0  ;;  %489 = vmatpush3.bf16.msra.mxu1 %v542_v6  ;;  %v538_v9 = vld [vmem:[#allocation3 + $0x20] sm:$0xff]   ;;  %v545_v12 = vld [vmem:[#allocation3 + $0x58] sm:$0xff]   ;;  %v540_v13 = vld [vmem:[#allocation3 + $0x30] sm:$0xff]   ;;  %p581_p8 = scmp.ne.s32.totalorder %s394_s8, %s580_s9  ;;  %p586_p10 = scmp.lt.s32.totalorder %s580_s9, %s580_s9 }
  0x18   :  { %490 = vmatprep.subr.bf16.mxu1 %v609_v0  ;;  %v546_v14 = vld [vmem:[#allocation3 + $0x60] sm:$0xff]   ;;  %v541_v15 = vld [vmem:[#allocation3 + $0x38] sm:$0xff]   ;;  %v547_v18 = vld [vmem:[#allocation3 + $0x68] sm:$0xff]  }
  0x19   :  { %v548_v20 = vld [vmem:[#allocation3 + $0x70] sm:$0xff]   ;;  %v549_v21 = vld [vmem:[#allocation3 + $0x78] sm:$0xff]   ;;  %v550_v22 = vld [vmem:[#allocation3 + $0x80] sm:$0xff]   ;;  %p587_p11 = por %p586_p10, %p585_p9 }
  0x1a   :  { %471 = vmatpush3.bf16.msra.mxu0 %v535_v2  ;;  %v551_v23 = vld [vmem:[#allocation3 + $0x88] sm:$0xff]   ;;  %v552_v24 = vld [vmem:[#allocation3 + $0x90] sm:$0xff]   ;;  %v553_v25 = vld [vmem:[#allocation3 + $0x98] sm:$0xff]  }
  0x1b   :  { %472 = vmatprep.subr.bf16.mxu0 %v609_v0  ;;  %491 = vmatpush3.bf16.msra.mxu1 %v543_v8  ;;  %v554_v26 = vld [vmem:[#allocation3 + $0xa0] sm:$0xff]   ;;  %v555_v27 = vld [vmem:[#allocation3 + $0xa8] sm:$0xff]   ;;  %v405_v28 = vld [vmem:[%s711_s2] ss:$0 sm:$0xff]  ;;  %p588_p12 = pnand %p587_p11, %p581_p8 }
  0x1c   :  { %492 = vmatprep.subr.bf16.mxu1 %v609_v0  ;;  %v37_v16 = vld [vmem:[#allocation2] sm:$0xff]  ;;  %v557_v39 = vld [vmem:[#allocation3 + $0xb8] sm:$0xff]  }
  0x1d   :  { %v38_v17 = vld [vmem:[#allocation2 + $0x8] sm:$0xff]  ;;  %v556_v38 = vld [vmem:[#allocation3 + $0xb0] sm:$0xff]  }
  0x1e   :  { %473 = vmatpush3.bf16.msra.mxu0 %v536_v3  ;;  %v39_v19 = vpack.c.bf16 %v38_v17, %v37_v16  ;;  %v414_v40 = vld [vmem:[%s711_s2 + $0x1] ss:$0 sm:$0xff]  ;;  %v423_v50 = vld [vmem:[%s711_s2 + $0x2] ss:$0 sm:$0xff] }
  0x1f   :  { %474 = vmatprep.subr.bf16.mxu0 %v609_v0  ;;  %493 = vmatpush3.bf16.msra.mxu1 %v544_v10 }
  0x20   :  { %494 = vmatprep.subr.bf16.mxu1 %v609_v0 }
  0x22   :  { %475 = vmatpush3.bf16.msra.mxu0 %v537_v7 }
  0x23   :  { %476 = vmatprep.subr.bf16.mxu0 %v609_v0  ;;  %495 = vmatpush3.bf16.msra.mxu1 %v545_v12 }
  0x24   :  { %496 = vmatprep.subr.bf16.mxu1 %v609_v0 }
  0x26   :  { %477 = vmatpush3.bf16.msra.mxu0 %v538_v9 }
  0x27   :  { %478 = vmatprep.subr.bf16.mxu0 %v609_v0  ;;  %497 = vmatpush3.bf16.msra.mxu1 %v546_v14 }
  0x28   :  { %498 = vmatprep.subr.bf16.mxu1 %v609_v0 }
  0x2a   :  { %479 = vmatpush3.bf16.msra.mxu0 %v539_v11 }
  0x2b   :  { %480 = vmatprep.subr.bf16.mxu0 %v609_v0  ;;  %499 = vmatpush3.bf16.msra.mxu1 %v547_v18 }
  0x2c   :  { %500 = vmatprep.subr.bf16.mxu1 %v609_v0 }
  0x2e   :  { %481 = vmatpush3.bf16.msra.mxu0 %v540_v13 }
  0x2f   :  { %482 = vmatprep.subr.bf16.mxu0 %v609_v0  ;;  %501 = vmatpush3.bf16.msra.mxu1 %v548_v20 }
  0x30   :  { %502 = vmatprep.subr.bf16.mxu1 %v609_v0 }
  0x32   :  { %483 = vmatpush3.bf16.msra.mxu0 %v541_v15 }
  0x33   :  { %508 = vmatprep.subr.bf16.mxu0 %v609_v0  ;;  %503 = vmatpush3.bf16.msra.mxu1 %v549_v21 }
  0x35   :  { %485 = vmatmul.mubr.bf16.vlgmr.msra.gmra.mrb[0].mxu0 %v39_v19 }
  0x36   :  { %524 = vmatprep.mubr.msk.bf16.mxu0 %vm610_vm0, %v609_v0  ;;  %509 = vmatpush3.bf16.msra.mxu0 %v550_v22 }
  0x37   :  { %510 = vmatprep.subr.bf16.mxu0 %v609_v0 }
  0x3a   :  { %511 = vmatpush3.bf16.msra.mxu0 %v551_v23 }
  0x3b   :  { %512 = vmatprep.subr.bf16.mxu0 %v609_v0 }
  0x3e   :  { %513 = vmatpush3.bf16.msra.mxu0 %v552_v24 }
  0x3f   :  { %514 = vmatprep.subr.bf16.mxu0 %v609_v0 }
  0x42   :  { %515 = vmatpush3.bf16.msra.mxu0 %v553_v25 }
  0x43   :  { %516 = vmatprep.subr.bf16.mxu0 %v609_v0 }
  0x46   :  { %517 = vmatpush3.bf16.msra.mxu0 %v554_v26 }
  0x47   :  { %518 = vmatprep.subr.bf16.mxu0 %v609_v0 }
  0x4a   :  { %519 = vmatpush3.bf16.msra.mxu0 %v555_v27 }
  0x4b   :  { %520 = vmatprep.subr.bf16.mxu0 %v609_v0 }
  0x4e   :  { %521 = vmatpush3.bf16.msra.mxu0 %v556_v38 }
  0x4f   :  { %522 = vmatprep.subr.bf16.mxu0 %v609_v0 }
  0x52   :  { %523 = vmatpush3.bf16.msra.mxu0 %v557_v39 }
 0x108   :  { %v143_v29 = vpop.f32.mrb[0].mxu0 }
 0x109   :  { %v144_v30 = vadd.f32 %v405_v28, %v143_v29  ;;  %v486_v31 = vpop.f32.mrb[1].mxu0 }
 0x10a   :  { %v146_v32 = vpop.f32.mrb[2].mxu0 }
 0x10b   :  { %v147_v33 = vadd.f32 %v405_v28, %v146_v32  ;;  %v487_v34 = vpop.f32.mrb[3].mxu0  ;;  %v150_v35 = vmax.f32 %v144_v30, 0.0 }
 0x10d   :  { %v151_v36 = vmax.f32 %v147_v33, 0.0 }
 0x10f   :  { %v152_v37 = vpack.c.bf16 %v151_v36, %v150_v35 }
 0x111   :  { %505 = vmatmul.mubr.bf16.vlgmr.msra.gmra.mrb[0].mxu1 %v152_v37 }
 0x1e4   :  { %v257_v41 = vpop.f32.mrb[0].mxu1 }
 0x1e5   :  { %v258_v42 = vadd.f32 %v414_v40, %v257_v41  ;;  %v506_v43 = vpop.f32.mrb[1].mxu1 }
 0x1e6   :  { %v260_v44 = vpop.f32.mrb[2].mxu1 }
 0x1e7   :  { %v261_v45 = vadd.f32 %v414_v40, %v260_v44  ;;  %v507_v46 = vpop.f32.mrb[3].mxu1  ;;  %v264_v47 = vmax.f32 %v258_v42, 0.0 }
 0x1e9   :  { %v265_v48 = vmax.f32 %v261_v45, 0.0 }
 0x1eb   :  { %v266_v49 = vpack.c.bf16 %v265_v48, %v264_v47 }
 0x1ed   :  { %525 = vmatmul.mubr.bf16.vlgmr.msra.gmra.mrb[4].mxu0 %v266_v49 }
 0x2c0   :  { %v371_v51 = vpop.f32.mrb[4].mxu0 }
 0x2c1   :  { %v526_v52 = vpop.f32.mrb[5].mxu0  ;;  %v372_v54 = vadd.f32 %v423_v50, %v371_v51 }
 0x2c2   :  { %v374_v53 = vpop.f32.mrb[6].mxu0 }
 0x2c3   :  { %v375_v55 = vadd.f32 %v423_v50, %v374_v53  ;;  %v527_v56 = vpop.f32.mrb[7].mxu0 }
 0x2c5   :  { %v439_v57 = vpack.c.bf16 %v375_v55, %v372_v54 }
 0x2c7   :  { %440 = vst [vmem:[#allocation6] sm:$0xff] %v439_v57  }
 0x2c8   :  { %591 = shalt.err (!%p588_p12)
}
 0x2c9   :  { %s592_s11 = scalar_lea.hbm %s712_s3, 128 }
 0x2ca   :  { %p593_p13 = scmp.ne.s32.totalorder %s712_s3, %s592_s11  ;;  %p596_p0 = scmp.lt.u32.totalorder %s592_s11, %s712_s3 }
 0x2cc   :  { %p598_p1 = pnand %p596_p0, %p593_p13 }
 0x2ce   :  { %601 = shalt.err (!%p598_p1)
}
 0x2cf   :  { %399 = dma.vmem_to_hbm [thread:$0]  %s394_s8, 128, %s712_s3, [#allocation5], %s607_s22, %s607_s22, %s608_s23  }
 0x2d0   :  { %604 = dma.done.wait [#allocation5], 128  }
 0x2d1   :  { %605 = vsyncadd [#allocation5], 4294967168 }
 0x2d2   :  { %403 = vsyncpa [#allocation4], 1 }
 0x2d3   :  { %404 = vsyncpa [#allocation5], 1 }

</bundles_post_ra>
